<compile_context>
chip_gen: v6e
topology: v6e:2x2x1
jax: 0.10.0
libtpu: 0.0.40
codegen_flags: <defaults>
</compile_context>

<pallas_src>
import functools

import jax
import jax.numpy as jnp
from jax.experimental import pallas as pl
from jax.experimental.pallas import tpu as pltpu


def _pick_tile_t(T, K, D, target=512, budget_bytes=40 << 20):
    """Largest lane tile TT <= target that divides T, is a multiple of 128
    (or the full T), and whose per-step working set fits the VMEM budget."""
    def working_bytes(tt):
        # ~4 live f32 (K, tt) intermediates (scores, d, iota, enc)
        # + double-buffered (D, tt) input/output tiles + resident codebooks.
        return 4 * K * tt * 4 + 4 * D * tt * 4 + 2 * K * D * 4

    target = max(128, min(target, T))
    for tt in range(target, 127, -1):
        if T % tt == 0 and tt % 128 == 0 and working_bytes(tt) <= budget_bytes:
            return tt
    # TODO(synk): ragged-T fallback streams the whole sequence per batch
    #             element; masked ragged tiles would avoid the bigger tile.
    return T


def _vq_kernel(x_ref, emb_ref, embt_ref, hsq_ref, ovr_ref,
               q_ref, idx_ref, hist_ref, sse_ref, *, bf16_scores):
    # x_ref:    (D, TT)  native-layout input columns for one (b, tile) step
    # emb_ref:  (K, D)   codebook (VMEM-resident across the grid)
    # embt_ref: (D, K)   codebook transpose (resident) for the gather matmul
    # hsq_ref:  (K, 1)   0.5 * ||e_k||^2 (resident)
    # ovr_ref:  (1, TT)  int32 override indices (-1 => keep argmin)
    x = x_ref[...]
    emb = emb_ref[...]
    emb_t = embt_ref[...]

    # scores[k, t] = e_k . x_t  — plain (K, D) @ (D, TT) on the MXU.
    if bf16_scores:
        scores = jax.lax.dot_general(
            emb.astype(jnp.bfloat16), x.astype(jnp.bfloat16),
            dimension_numbers=(((1,), (0,)), ((), ())),
            preferred_element_type=jnp.float32)
    else:
        scores = jax.lax.dot_general(
            emb, x,
            dimension_numbers=(((1,), (0,)), ((), ())),
            preferred_element_type=jnp.float32)                  # (K, TT)

    # distances up to a per-column constant: 0.5*||e||^2 - e.x (argmin kept).
    d = hsq_ref[...] - scores                                    # (K, TT)

    k, tt = d.shape
    row = jax.lax.broadcasted_iota(jnp.int32, (k, tt), 0)
    d_min = jnp.min(d, axis=0, keepdims=True)                    # (1, TT)
    # first index achieving the min (matches torch.argmin tie-breaking)
    idx = jnp.min(jnp.where(d == d_min, row, k), axis=0, keepdims=True)

    # rows 27:36 were replaced with random codes in the PyTorch module.
    ovr = ovr_ref[...]
    idx = jnp.where(ovr >= 0, ovr, idx).astype(jnp.int32)        # (1, TT)

    # one-hot columns and quantization (gather via MXU matmul, f32 exact).
    enc = (row == idx).astype(jnp.float32)                       # (K, TT)
    quant = jax.lax.dot_general(
        emb_t, enc,
        dimension_numbers=(((1,), (0,)), ((), ())),
        preferred_element_type=jnp.float32)                      # (D, TT)

    q_ref[...] = quant.astype(q_ref.dtype)
    idx_ref[...] = idx

    # per-tile code histogram, kept lane-dense via a tiny matvec: (1,TT)x(K,TT)^T
    ones_row = jnp.ones((1, tt), jnp.float32)
    hist_ref[...] = jax.lax.dot_general(
        ones_row, enc,
        dimension_numbers=(((1,), (1,)), ((), ())),
        preferred_element_type=jnp.float32)                      # (1, K)

    # per-tile SSE partial sums (sublane reduce over D -> lane vector)
    diff = quant - x
    sse_ref[...] = jnp.sum(diff * diff, axis=0, keepdims=True)   # (1, TT)


def vector_quantizer_forward(x, embedding, commitment_cost, override_idx,
                             *, tile_t=512, bf16_scores=False):
    """Pallas TPU forward of VectorQuantizer (mode='vqvae').

    x:            (B, D, T) float  -- same axis convention as the torch module
    embedding:    (K, D)    float  -- nn.Embedding weight
    override_idx: (B*T, 1)  int32  -- >=0 replaces the argmin index (rows 27:36
                                      random in the torch module), -1 keeps it.
    Returns (loss, quantized (B, D, T), perplexity, encoding_indices (B*T, 1)).
    """
    B, D, T = x.shape
    K, De = embedding.shape
    assert De == D, "embedding_dim mismatch"
    N = B * T

    x_f32 = x.astype(jnp.float32)                     # native layout, no transpose
    emb_f32 = embedding.astype(jnp.float32)           # (K, D)
    emb_t = jnp.transpose(emb_f32)                    # (D, K)  tiny, one-time
    half_sq = 0.5 * jnp.sum(emb_f32 * emb_f32, axis=1, keepdims=True)   # (K, 1)
    ovr = override_idx.astype(jnp.int32).reshape(B, 1, T)

    tt = _pick_tile_t(T, K, D, target=tile_t)
    num_tt = T // tt
    grid = (B, num_tt)

    kernel = functools.partial(_vq_kernel, bf16_scores=bf16_scores)

    grid_spec = pltpu.PrefetchScalarGridSpec(
        num_scalar_prefetch=0,
        grid=grid,
        in_specs=[
            pl.BlockSpec((None, D, tt), lambda b, t: (b, 0, t)),   # x columns
            pl.BlockSpec((K, D), lambda b, t: (0, 0)),             # codebook
            pl.BlockSpec((D, K), lambda b, t: (0, 0)),             # codebook^T
            pl.BlockSpec((K, 1), lambda b, t: (0, 0)),             # 0.5*||e||^2
            pl.BlockSpec((None, 1, tt), lambda b, t: (b, 0, t)),   # override ids
        ],
        out_specs=[
            pl.BlockSpec((None, D, tt), lambda b, t: (b, 0, t)),          # quantized
            pl.BlockSpec((None, 1, tt), lambda b, t: (b, 0, t)),          # indices
            pl.BlockSpec((None, None, 1, K), lambda b, t: (b, t, 0, 0)),  # histograms
            pl.BlockSpec((None, None, 1, tt), lambda b, t: (b, t, 0, 0)), # SSE lanes
        ],
    )

    quant, idx_bt, hist, sse = pl.pallas_call(
        kernel,
        out_shape=(
            jax.ShapeDtypeStruct((B, D, T), jnp.float32),
            jax.ShapeDtypeStruct((B, 1, T), jnp.int32),
            jax.ShapeDtypeStruct((B, num_tt, 1, K), jnp.float32),
            jax.ShapeDtypeStruct((B, num_tt, 1, tt), jnp.float32),
        ),
        grid_spec=grid_spec,
        compiler_params=pltpu.CompilerParams(
            dimension_semantics=("parallel", "parallel"),
            vmem_limit_bytes=48 * 1024 * 1024,   # safe on v5e/v6e (128 MiB) and v7x (64 MiB)
        ),
    )(x_f32, emb_f32, emb_t, half_sq, ovr)

    enc_idx = idx_bt.reshape(N, 1)                    # (N, 1), n = b*T + t

    # perplexity from in-kernel per-tile histograms (no XLA scatter-add).
    counts = jnp.sum(hist, axis=(0, 1, 2))            # (K,)
    avg_probs = counts / N
    perplexity = jnp.exp(-jnp.sum(avg_probs * jnp.log(avg_probs + 1e-10)))

    # loss from in-kernel per-tile SSE partials (no second HBM pass).
    mse = jnp.sum(sse) / (N * D)
    loss = mse + commitment_cost * mse                # q_latent + c * e_latent (fwd)

    # Straight-through estimator: forward value == quantized, already (B, D, T).
    quant_st = x_f32 + jax.lax.stop_gradient(quant - x_f32)
    return loss, quant_st, perplexity, enc_idx


def _reference(x, embedding, commitment_cost, override_idx):
    """Pure-JAX mirror of the PyTorch forward (vqvae mode, same overrides)."""
    B, D, T = x.shape
    K = embedding.shape[0]
    xp = jnp.transpose(x, (0, 2, 1)).astype(jnp.float32)
    flat = xp.reshape(-1, D)
    emb = embedding.astype(jnp.float32)
    dist = (jnp.sum(flat ** 2, axis=1, keepdims=True)
            + jnp.sum(emb ** 2, axis=1)
            - 2.0 * flat @ emb.T)
    idx = jnp.argmin(dist, axis=1).astype(jnp.int32)
    idx = jnp.where(override_idx[:, 0] >= 0, override_idx[:, 0], idx)
    enc = jax.nn.one_hot(idx, K, dtype=jnp.float32)
    quant = (enc @ emb).reshape(xp.shape)
    mse = jnp.mean((quant - xp) ** 2)
    loss = mse + commitment_cost * mse
    avg_probs = jnp.mean(enc, axis=0)
    perplexity = jnp.exp(-jnp.sum(avg_probs * jnp.log(avg_probs + 1e-10)))
    return loss, jnp.transpose(quant, (0, 2, 1)), perplexity, idx[:, None]


if __name__ == "__main__":
    # Small shapes consistent with the module: x is (batch, embedding_dim, seq).
    B, D, T = 2, 64, 128          # batch=2, embedding_dim=64, seq=128
    K = 128                       # num_embeddings (lane-dense)
    commitment_cost = 0.25

    key = jax.random.PRNGKey(0)
    kx, ke, kr = jax.random.split(key, 3)
    x = jax.random.normal(kx, (B, D, T), dtype=jnp.float32)
    # nn.Embedding weight ~ U(-1/K, 1/K)
    embedding = jax.random.uniform(ke, (K, D), jnp.float32,
                                   minval=-1.0 / K, maxval=1.0 / K)

    # Deterministic stand-in for the module's torch.randint override of rows 27:36.
    N = B * T
    a, b = 27, 36
    rand_idx = jax.random.randint(kr, (N, 1), 0, K, dtype=jnp.int32)
    rows = jnp.arange(N)[:, None]
    override = jnp.where((rows >= a) & (rows < b), rand_idx, -1).astype(jnp.int32)

    loss, quantized, perplexity, enc_idx = vector_quantizer_forward(
        x, embedding, commitment_cost, override)
    jax.block_until_ready((loss, quantized, perplexity, enc_idx))

    # Check against a pure-JAX reference using the same override indices.
    loss_r, quant_r, perp_r, idx_r = _reference(x, embedding, commitment_cost,
                                                override)
    assert jnp.array_equal(enc_idx, idx_r), "encoding indices mismatch"
    assert jnp.allclose(quantized, quant_r, atol=1e-5, rtol=1e-5)
    assert jnp.allclose(loss, loss_r, atol=1e-5, rtol=1e-5)
    assert jnp.allclose(perplexity, perp_r, atol=1e-4, rtol=1e-5)

    print("KERNEL_OK")
</pallas_src>

<mosaic_0001>
module attributes {stable_mosaic.version = 11 : i64} {
  func.func @_vq_kernel(%arg0: i32, %arg1: i32, %arg2: memref<1x64x128xf32, #tpu.memory_space<vmem>>, %arg3: memref<128x64xf32, #tpu.memory_space<vmem>>, %arg4: memref<64x128xf32, #tpu.memory_space<vmem>>, %arg5: memref<128x1xf32, #tpu.memory_space<vmem>>, %arg6: memref<1x1x128xi32, #tpu.memory_space<vmem>>, %arg7: memref<1x64x128xf32, #tpu.memory_space<vmem>>, %arg8: memref<1x1x128xi32, #tpu.memory_space<vmem>>, %arg9: memref<1x1x1x128xf32, #tpu.memory_space<vmem>>, %arg10: memref<1x1x1x128xf32, #tpu.memory_space<vmem>>) attributes {dimension_semantics = [#tpu.dimension_semantics<parallel>, #tpu.dimension_semantics<parallel>], iteration_bounds = array<i64: 2, 1>, scalar_prefetch = 0 : i64, scratch_operands = 0 : i64, tpu.core_type = #tpu.core_type<tc>, window_params = [{transform_indices = @transform_0, window_bounds = array<i64: 1, 64, 128>}, {pipeline_mode = #tpu.pipeline_mode<synchronous>, transform_indices = @transform_1, window_bounds = array<i64: 128, 64>}, {pipeline_mode = #tpu.pipeline_mode<synchronous>, transform_indices = @transform_2, window_bounds = array<i64: 64, 128>}, {pipeline_mode = #tpu.pipeline_mode<synchronous>, transform_indices = @transform_3, window_bounds = array<i64: 128, 1>}, {transform_indices = @transform_4, window_bounds = array<i64: 1, 1, 128>}, {transform_indices = @transform_5, window_bounds = array<i64: 1, 64, 128>}, {transform_indices = @transform_6, window_bounds = array<i64: 1, 1, 128>}, {transform_indices = @transform_7, window_bounds = array<i64: 1, 1, 1, 128>}, {transform_indices = @transform_8, window_bounds = array<i64: 1, 1, 1, 128>}]} {
    %c0 = arith.constant 0 : index
    %c0_0 = arith.constant 0 : index
    %c0_1 = arith.constant 0 : index
    %0 = vector.load %arg2[%c0, %c0_0, %c0_1] : memref<1x64x128xf32, #tpu.memory_space<vmem>>, vector<1x64x128xf32>
    %1 = vector.shape_cast %0 : vector<1x64x128xf32> to vector<64x128xf32>
    %c0_2 = arith.constant 0 : index
    %c0_3 = arith.constant 0 : index
    %2 = vector.load %arg3[%c0_2, %c0_3] : memref<128x64xf32, #tpu.memory_space<vmem>>, vector<128x64xf32>
    %c0_4 = arith.constant 0 : index
    %c0_5 = arith.constant 0 : index
    %3 = vector.load %arg4[%c0_4, %c0_5] : memref<64x128xf32, #tpu.memory_space<vmem>>, vector<64x128xf32>
    %cst = arith.constant dense<0.000000e+00> : vector<128x128xf32>
    %4 = tpu.matmul %2, %1, %cst {dimension_numbers = #tpu.dot_dimension_numbers<[1], [0], [0], [1], [0, 0, 1, 1], [], []>} : vector<128x64xf32>, vector<64x128xf32>, vector<128x128xf32> -> vector<128x128xf32>
    %c0_6 = arith.constant 0 : index
    %c0_7 = arith.constant 0 : index
    %5 = vector.load %arg5[%c0_6, %c0_7] : memref<128x1xf32, #tpu.memory_space<vmem>>, vector<128x1xf32>
    %6 = vector.broadcast %5 : vector<128x1xf32> to vector<128x128xf32>
    %7 = arith.subf %6, %4 : vector<128x128xf32>
    %8 = tpu.iota {dimensions = array<i32: 0>} : vector<128x128xi32>
    %cst_8 = arith.constant dense<0x7F800000> : vector<128xf32>
    %9 = vector.multi_reduction <minimumf>, %7, %cst_8 [0] : vector<128x128xf32> to vector<128xf32>
    %10 = vector.shape_cast %9 : vector<128xf32> to vector<1x128xf32>
    %11 = vector.broadcast %10 : vector<1x128xf32> to vector<128x128xf32>
    %12 = arith.cmpf oeq, %7, %11 : vector<128x128xf32>
    %c128_i32 = arith.constant 128 : i32
    %13 = vector.broadcast %c128_i32 : i32 to vector<128x128xi32>
    %14 = arith.select %12, %8, %13 : vector<128x128xi1>, vector<128x128xi32>
    %cst_9 = arith.constant dense<2147483647> : vector<128xi32>
    %15 = vector.multi_reduction <minsi>, %14, %cst_9 [0] : vector<128x128xi32> to vector<128xi32>
    %16 = vector.shape_cast %15 : vector<128xi32> to vector<1x128xi32>
    %c0_10 = arith.constant 0 : index
    %c0_11 = arith.constant 0 : index
    %c0_12 = arith.constant 0 : index
    %17 = vector.load %arg6[%c0_10, %c0_11, %c0_12] : memref<1x1x128xi32, #tpu.memory_space<vmem>>, vector<1x1x128xi32>
    %18 = vector.shape_cast %17 : vector<1x1x128xi32> to vector<1x128xi32>
    %c0_i32 = arith.constant 0 : i32
    %19 = vector.broadcast %c0_i32 : i32 to vector<1x128xi32>
    %20 = arith.cmpi sge, %18, %19 : vector<1x128xi32>
    %21 = arith.select %20, %18, %16 : vector<1x128xi1>, vector<1x128xi32>
    %22 = vector.broadcast %21 : vector<1x128xi32> to vector<128x128xi32>
    %23 = arith.cmpi eq, %8, %22 : vector<128x128xi32>
    %24 = arith.extui %23 : vector<128x128xi1> to vector<128x128xi32>
    %25 = arith.sitofp %24 : vector<128x128xi32> to vector<128x128xf32>
    %cst_13 = arith.constant dense<0.000000e+00> : vector<64x128xf32>
    %26 = tpu.matmul %3, %25, %cst_13 {dimension_numbers = #tpu.dot_dimension_numbers<[1], [0], [0], [1], [0, 0, 1, 1], [], []>} : vector<64x128xf32>, vector<128x128xf32>, vector<64x128xf32> -> vector<64x128xf32>
    %c0_14 = arith.constant 0 : index
    %c0_15 = arith.constant 0 : index
    %c0_16 = arith.constant 0 : index
    %27 = vector.load %arg7[%c0_14, %c0_15, %c0_16] : memref<1x64x128xf32, #tpu.memory_space<vmem>>, vector<1x64x128xf32>
    %28 = vector.shape_cast %27 : vector<1x64x128xf32> to vector<64x128xf32>
    %29 = vector.shape_cast %26 : vector<64x128xf32> to vector<1x64x128xf32>
    tpu.vector_store %arg7[%c0_14, %c0_15, %c0_16], %29 {strides = array<i32>} : memref<1x64x128xf32, #tpu.memory_space<vmem>>, vector<1x64x128xf32>,
    %c0_17 = arith.constant 0 : index
    %c0_18 = arith.constant 0 : index
    %c0_19 = arith.constant 0 : index
    %30 = vector.load %arg8[%c0_17, %c0_18, %c0_19] : memref<1x1x128xi32, #tpu.memory_space<vmem>>, vector<1x1x128xi32>
    %31 = vector.shape_cast %30 : vector<1x1x128xi32> to vector<1x128xi32>
    %32 = vector.shape_cast %21 : vector<1x128xi32> to vector<1x1x128xi32>
    tpu.vector_store %arg8[%c0_17, %c0_18, %c0_19], %32 {strides = array<i32>} : memref<1x1x128xi32, #tpu.memory_space<vmem>>, vector<1x1x128xi32>,
    %cst_20 = arith.constant 1.000000e+00 : f32
    %33 = vector.broadcast %cst_20 : f32 to vector<1x128xf32>
    %cst_21 = arith.constant dense<0.000000e+00> : vector<1x128xf32>
    %34 = tpu.matmul %33, %25, %cst_21 {dimension_numbers = #tpu.dot_dimension_numbers<[1], [1], [0], [0], [0, 0, 1, 0], [], []>} : vector<1x128xf32>, vector<128x128xf32>, vector<1x128xf32> -> vector<1x128xf32>
    %c0_22 = arith.constant 0 : index
    %c0_23 = arith.constant 0 : index
    %c0_24 = arith.constant 0 : index
    %c0_25 = arith.constant 0 : index
    %35 = vector.load %arg9[%c0_22, %c0_23, %c0_24, %c0_25] : memref<1x1x1x128xf32, #tpu.memory_space<vmem>>, vector<1x1x1x128xf32>
    %36 = vector.shape_cast %35 : vector<1x1x1x128xf32> to vector<1x128xf32>
    %37 = vector.shape_cast %34 : vector<1x128xf32> to vector<1x1x1x128xf32>
    tpu.vector_store %arg9[%c0_22, %c0_23, %c0_24, %c0_25], %37 {strides = array<i32>} : memref<1x1x1x128xf32, #tpu.memory_space<vmem>>, vector<1x1x1x128xf32>,
    %38 = arith.subf %26, %1 : vector<64x128xf32>
    %39 = arith.mulf %38, %38 : vector<64x128xf32>
    %cst_26 = arith.constant dense<0.000000e+00> : vector<128xf32>
    %40 = vector.multi_reduction <add>, %39, %cst_26 [0] : vector<64x128xf32> to vector<128xf32>
    %41 = vector.shape_cast %40 : vector<128xf32> to vector<1x128xf32>
    %c0_27 = arith.constant 0 : index
    %c0_28 = arith.constant 0 : index
    %c0_29 = arith.constant 0 : index
    %c0_30 = arith.constant 0 : index
    %42 = vector.load %arg10[%c0_27, %c0_28, %c0_29, %c0_30] : memref<1x1x1x128xf32, #tpu.memory_space<vmem>>, vector<1x1x1x128xf32>
    %43 = vector.shape_cast %42 : vector<1x1x1x128xf32> to vector<1x128xf32>
    %44 = vector.shape_cast %41 : vector<1x128xf32> to vector<1x1x1x128xf32>
    tpu.vector_store %arg10[%c0_27, %c0_28, %c0_29, %c0_30], %44 {strides = array<i32>} : memref<1x1x1x128xf32, #tpu.memory_space<vmem>>, vector<1x1x1x128xf32>,
    return
  }
  func.func @transform_0(%arg0: i32, %arg1: i32) -> (i32, i32, i32) {
    %c0_i32 = arith.constant 0 : i32
    %c0_i32_0 = arith.constant 0 : i32
    return %arg0, %c0_i32, %arg1 : i32, i32, i32
  }
  func.func @transform_1(%arg0: i32, %arg1: i32) -> (i32, i32) {
    %c0_i32 = arith.constant 0 : i32
    %c0_i32_0 = arith.constant 0 : i32
    %c0_i32_1 = arith.constant 0 : i32
    return %c0_i32, %c0_i32_0 : i32, i32
  }
  func.func @transform_2(%arg0: i32, %arg1: i32) -> (i32, i32) {
    %c0_i32 = arith.constant 0 : i32
    %c0_i32_0 = arith.constant 0 : i32
    %c0_i32_1 = arith.constant 0 : i32
    return %c0_i32, %c0_i32_0 : i32, i32
  }
  func.func @transform_3(%arg0: i32, %arg1: i32) -> (i32, i32) {
    %c0_i32 = arith.constant 0 : i32
    %c0_i32_0 = arith.constant 0 : i32
    %c0_i32_1 = arith.constant 0 : i32
    return %c0_i32, %c0_i32_0 : i32, i32
  }
  func.func @transform_4(%arg0: i32, %arg1: i32) -> (i32, i32, i32) {
    %c0_i32 = arith.constant 0 : i32
    %c0_i32_0 = arith.constant 0 : i32
    return %arg0, %c0_i32, %arg1 : i32, i32, i32
  }
  func.func @transform_5(%arg0: i32, %arg1: i32) -> (i32, i32, i32) {
    %c0_i32 = arith.constant 0 : i32
    %c0_i32_0 = arith.constant 0 : i32
    return %arg0, %c0_i32, %arg1 : i32, i32, i32
  }
  func.func @transform_6(%arg0: i32, %arg1: i32) -> (i32, i32, i32) {
    %c0_i32 = arith.constant 0 : i32
    %c0_i32_0 = arith.constant 0 : i32
    return %arg0, %c0_i32, %arg1 : i32, i32, i32
  }
  func.func @transform_7(%arg0: i32, %arg1: i32) -> (i32, i32, i32, i32) {
    %c0_i32 = arith.constant 0 : i32
    %c0_i32_0 = arith.constant 0 : i32
    %c0_i32_1 = arith.constant 0 : i32
    return %arg0, %arg1, %c0_i32, %c0_i32_0 : i32, i32, i32, i32
  }
  func.func @transform_8(%arg0: i32, %arg1: i32) -> (i32, i32, i32, i32) {
    %c0_i32 = arith.constant 0 : i32
    %c0_i32_0 = arith.constant 0 : i32
    %c0_i32_1 = arith.constant 0 : i32
    return %arg0, %arg1, %c0_i32, %c0_i32_0 : i32, i32, i32, i32
  }
}

</mosaic_0001>

<bundles_post_ra>
// kernel: tpu_custom_call.1
= control target key start
LH: loop header
LB: loop body
LE: loop exit
PB: predicated region body
PF: predicated region fallthrough
CT: control target
= control target key end

     0   :  { %s2653_s0 = inlined_call_operand.vmem [shape: f32[2,64,128], index: 0, kind: input, shape index: {}]   ;;  %s2654_s1 = inlined_call_operand.vmem [shape: f32[128,64], index: 1, kind: input, shape index: {}]   ;;  %s2655_s2 = inlined_call_operand.vmem [shape: f32[64,128], index: 2, kind: input, shape index: {}]   ;;  %s2656_s3 = inlined_call_operand.vmem [shape: f32[128,1], index: 3, kind: input, shape index: {}]   ;;  %s2657_s4 = inlined_call_operand.vmem [shape: s32[2,1,128], index: 4, kind: input, shape index: {}]   ;;  %s2658_s5 = inlined_call_operand.hbm [shape: f32[2,64,128], index: 5, kind: output, shape index: {0}]   ;;  %s2659_s6 = inlined_call_operand.hbm [shape: s32[2,1,128], index: 6, kind: output, shape index: {1}]   ;;  %s2660_s7 = inlined_call_operand.hbm [shape: f32[2,1,1,128], index: 7, kind: output, shape index: {2}]   ;;  %s2661_s8 = inlined_call_operand.hbm [shape: f32[2,1,1,128], index: 8, kind: output, shape index: {3}]  }
   0x1   :  { %2663 = sst [smem:[#allocation12_spill]] %s2653_s0 }
   0x2   :  { %2664 = sst [smem:[#allocation13_spill]] %s2654_s1 }
   0x3   :  { %2665 = sst [smem:[#allocation14_spill]] %s2655_s2 }
   0x4   :  { %14 = vsyncpa [#allocation3], 0 }
   0x5   :  { %16 = vsyncpa [#allocation3 + $0x1], 0 }
   0x6   :  { %17 = vsyncpa [#allocation5], 0 }
   0x7   :  { %19 = vsyncpa [#allocation5 + $0x1], 0 }
   0x8   :  { %20 = vsyncpa [#allocation8], 0 }
   0x9   :  { %22 = vsyncpa [#allocation8 + $0x1], 0  ;;  %s1908_s27 = smov 0   ;;  %s1910_s28 = smov 0  }
   0xa   :  { %s1912_s29 = smov 0   ;;  %s1914_s30 = smov 0  }
   0xb   :  { %s1916_s9 = smov 0   ;;  %s1918_s10 = smov 0  }
   0xc LB: > { %s1345_s11 = sadd.s32 4294967295, %s1851_s10   ;;  %s2662_s12 = sadd.s32 4294967294, %s1851_s10   ;;  %s1851_s10 = sphi %s1918_s10, %s28_s10   ;;  %s1847_s9 = sphi %s1916_s9, %s2678_s9   ;;  %s1843_s30 = sphi %s1914_s30, %s2677_s30   ;;  %s1839_s29 = sphi %s1912_s29, %s2676_s29   ;;  %s1835_s28 = sphi %s1910_s28, %s2675_s28   ;;  %s1831_s27 = sphi %s1908_s27, %s2674_s27  }
   0xd   : > { %s40_s13 = sadd.s32 1, %s1847_s9  ;;  %s168_s14 = sadd.s32 1, %s1839_s29 }
   0xe   : > { %p42_p0 = scmp.ge.s32.totalorder %s40_s13, 2  ;;  %p178_p1 = scmp.ne.s32.totalorder %s1839_s29, %s1835_s28 }
   0xf   : > { %p179_p2 = scmp.eq.s32.totalorder %s1345_s11, 1  ;;  %p184_p3 = scmp.ne.s32.totalorder %s1835_s28, %s1831_s27 }
  0x10   : > { %s2680_s13 = smov (%p42_p0, %s40_s13), 0  ;;  %p185_p5 = scmp.eq.s32.totalorder %s2662_s12, 1 }
  0x11   : > { %p1950_p4 = por %p179_p2, %p178_p1  ;;  %s163_s16 = ssub.s32 %s1847_s9, %s2680_s13 }
  0x12   : > { %p1349_p6 = scmp.ge.s32.totalorder %s1851_s10, 1  ;;  %p166_p7 = scmp.eq.s32.totalorder %s163_s16, 0 }
  0x13   : > { %p1959_p8 = por %p185_p5, %p184_p3  ;;  %p316_p9 = scmp.lt.s32.totalorder %s1851_s10, 3 }
  0x14   : > { %s1965_s18 = scalar_select %p166_p7, %s1839_s29, %s168_s14  }
  0x15   : > { %p317_p10 = pnand %p1349_p6, %p316_p9 }
  0x16   : > { %p371_p11 = scmp.lt.s32.totalorder (!%p317_p10), %s1843_s30, 1  ;;  %s2668_s1 = sld [smem:[#allocation13_spill]] (!%p317_p10) }
  0x17   : > { %320 = sbr.rel (%p317_p10) target bundleno = 627 (0x273), region = 40  ;;  %s2669_s0 = sld [smem:[#allocation12_spill]] (!%p317_p10) }
  0x18   : > { %s2670_s2 = sld [smem:[#allocation14_spill]] (!%p317_p10)  ;;  %s1857_s12 = smov (!%p317_p10), [#allocation4]  }
  0x1c   : > { %v393_v0 = vld [vmem:[%s2668_s1] sm:$0xff]  ;;  %vm417_vm0 = vcmask 523264   ;;  %v1853_v1 = vmov 0   ;;  %s1973_s21 = scalar_select %p371_p11, %s1843_s30, 1  ;;  %v613_v2 = vld [vmem:[%s2656_s3 + $0x10] sm:$0xff]  ;;  %v614_v7 = vld [vmem:[%s2656_s3 + $0x18] sm:$0xff] }
  0x1d   : > { %1508 = vmatprep.mubr.msk.f32.mxu1 %vm417_vm0, %v393_v0  ;;  %1688 = vset.pattern.permute.xlu1 %v1853_v1  ;;  %v611_v6 = vld [vmem:[%s2656_s3] sm:$0xff]  ;;  %v612_v9 = vld [vmem:[%s2656_s3 + $0x8] sm:$0xff]  ;;  %v618_v14 = vld [vmem:[%s2656_s3 + $0x38] sm:$0xff]  ;;  %v1854_v41 = vmov 0.0   ;;  %vm1855_vm1 = vmmov 0  }
  0x1e   : > { %1687 = vset.pattern.permute.xlu0 %v1853_v1  ;;  %s1425_s22 = sshll.u32 %s1973_s21, 6  ;;  %639 = vperm.xlu1 %1688, %v613_v2   ;;  %v616_v10 = vld [vmem:[%s2656_s3 + $0x28] sm:$0xff]  ;;  %v615_v13 = vld [vmem:[%s2656_s3 + $0x20] sm:$0xff]  ;;  %v617_v17 = vld [vmem:[%s2656_s3 + $0x30] sm:$0xff]  ;;  %s384_s20 = scalar_lea.vmem %s2657_s4, %s1973_s21 }
  0x1f   : > { %s1979_s25 = scalar_lea.vmem %s2669_s0, %s1425_s22  ;;  %629 = vperm.xlu0 %1687, %v611_v6   ;;  %v620_v18 = vld [vmem:[%s2656_s3 + $0x48] sm:$0xff]  ;;  %v395_v20 = vld [vmem:[%s2668_s1 + $0x10] sm:$0xff]  ;;  %v619_v21 = vld [vmem:[%s2656_s3 + $0x40] sm:$0xff]  ;;  %1576 = vmatprep.subr.mxu0 %v1854_v41  ;;  %s2252_s22 = sand.u32 1, %s1835_s28  }
  0x20   : > { %v1985_v3 = vld [vmem:[%s1979_s25 + $0x38] sm:$0xff]  ;;  %v1988_v4 = vld [vmem:[%s1979_s25 + $0x30] sm:$0xff]  ;;  %v1993_v5 = vld [vmem:[%s1979_s25 + $0x28] sm:$0xff]  ;;  %1608 = vmatprep.mubr.msk.f32.mxu0 %vm1855_vm1, %v1854_v41  ;;  %s358_s23 = scalar_lea.vmem [#allocation4], %s2252_s22 }
  0x21   : > { %1492 = vmatprep.subr.mxu1 %v1985_v3  ;;  %v2004_v8 = vld [vmem:[%s1979_s25 + $0x20] sm:$0xff]  ;;  %v2015_v11 = vld [vmem:[%s1979_s25 + $0x18] sm:$0xff]  ;;  %v2020_v12 = vld [vmem:[%s1979_s25 + $0x10] sm:$0xff]  ;;  %s1146_s14 = sshll.u32 %s358_s23, 4  ;;  %s1147_s14 = int_to_ptr.vmem [resolvable:$true] %s1146_s14 }
  0x22   : > { %1493 = vmatpush3.msra.mxu1 %v1985_v3  ;;  %644 = vperm.xlu1 %1688, %v614_v7   ;;  %v2031_v15 = vld [vmem:[%s1979_s25 + $0x8] sm:$0xff]  ;;  %v2036_v16 = vld [vmem:[%s1979_s25] sm:$0xff]  ;;  %v622_v22 = vld [vmem:[%s2656_s3 + $0x58] sm:$0xff]  ;;  %s2487_s25 = sand.u32 1, %s1345_s11   ;;  %s1689_s19 = scalar_lea.vmem %s1147_s14, 16 }
  0x23   : > { %1494 = vmatprep.subr.mxu1 %v1988_v4  ;;  %634 = vperm.xlu0 %1687, %v612_v9   ;;  %v394_v19 = vld [vmem:[%s2668_s1 + $0x8] sm:$0xff]  ;;  %v396_v23 = vld [vmem:[%s2668_s1 + $0x18] sm:$0xff]  ;;  %v397_v24 = vld [vmem:[%s2668_s1 + $0x20] sm:$0xff]  ;;  %p1690_p12 = scmp.ne.s32.totalorder %s1147_s14, %s1689_s19  ;;  %s1693_s11 = sshll.u32 %s1857_s12, 4  ;;  %s1694_s11 = int_to_ptr.vmem [resolvable:$false] %s1693_s11 }
  0x24   : > { %1495 = vmatpush3.msra.mxu1 %v1988_v4  ;;  %v621_v25 = vld [vmem:[%s2656_s3 + $0x50] sm:$0xff]  ;;  %v624_v26 = vld [vmem:[%s2656_s3 + $0x68] sm:$0xff]  ;;  %v623_v29 = vld [vmem:[%s2656_s3 + $0x60] sm:$0xff]  ;;  %s1695_s0 = scalar_lea.vmem %s1694_s11, 32  ;;  %p1696_p1 = scmp.lt.s32.totalorder %s1147_s14, %s1694_s11 }
  0x25   : > { %1496 = vmatprep.subr.mxu1 %v1993_v5  ;;  %v398_v27 = vld [vmem:[%s2668_s1 + $0x28] sm:$0xff]  ;;  %v399_v28 = vld [vmem:[%s2668_s1 + $0x30] sm:$0xff]  ;;  %v626_v30 = vld [vmem:[%s2656_s3 + $0x78] sm:$0xff]  ;;  %p1691_p13 = pnand %p1690_p12, %p1950_p4  ;;  %p1697_p2 = scmp.lt.s32.totalorder %s1695_s0, %s1689_s19 }
  0x26   : > { %1497 = vmatpush3.msra.mxu1 %v1993_v5  ;;  %654 = vperm.xlu1 %1688, %v616_v10   ;;  %v400_v31 = vld [vmem:[%s2668_s1 + $0x38] sm:$0xff]  ;;  %v401_v32 = vld [vmem:[%s2668_s1 + $0x40] sm:$0xff]  ;;  %v625_v33 = vld [vmem:[%s2656_s3 + $0x70] sm:$0xff] }
  0x27   : > { %1498 = vmatprep.subr.mxu1 %v2004_v8  ;;  %649 = vperm.xlu0 %1687, %v615_v13   ;;  %v402_v34 = vld [vmem:[%s2668_s1 + $0x48] sm:$0xff]  ;;  %v403_v35 = vld [vmem:[%s2668_s1 + $0x50] sm:$0xff]  ;;  %v404_v36 = vld [vmem:[%s2668_s1 + $0x58] sm:$0xff]  ;;  %p1692_p0 = pneg %p1691_p13  ;;  %p1698_p3 = por %p1697_p2, %p1696_p1 }
  0x28   : > { %1499 = vmatpush3.msra.mxu1 %v2004_v8  ;;  %v405_v37 = vld [vmem:[%s2668_s1 + $0x60] sm:$0xff]  ;;  %v406_v38 = vld [vmem:[%s2668_s1 + $0x68] sm:$0xff]  ;;  %v407_v39 = vld [vmem:[%s2668_s1 + $0x70] sm:$0xff] }
  0x29   : > { %1500 = vmatprep.subr.mxu1 %v2015_v11  ;;  %v408_v40 = vld [vmem:[%s2668_s1 + $0x78] sm:$0xff]  ;;  %v409_v44 = vld [vmem:[%s2670_s2] sm:$0xff]  ;;  %p1699_p5 = pnand %p1698_p3, %p1692_p0 }
  0x2a   : > { %1501 = vmatpush3.msra.mxu1 %v2015_v11  ;;  %664 = vperm.xlu1 %1688, %v618_v14  }
  0x2b   : > { %1502 = vmatprep.subr.mxu1 %v2020_v12  ;;  %659 = vperm.xlu0 %1687, %v617_v17  }
  0x2c   : > { %1503 = vmatpush3.msra.mxu1 %v2020_v12 }
  0x2d   : > { %1504 = vmatprep.subr.mxu1 %v2031_v15 }
  0x2e   : > { %1505 = vmatpush3.msra.mxu1 %v2031_v15  ;;  %674 = vperm.xlu1 %1688, %v620_v18  }
  0x2f   : > { %1506 = vmatprep.subr.mxu1 %v2036_v16  ;;  %669 = vperm.xlu0 %1687, %v619_v21  }
  0x30   : > { %1507 = vmatpush3.msra.mxu1 %v2036_v16 }
  0x31   : > { %1509 = vmatmul.mubr.msk.f32.vlgmr.msra.gmra.mxu1 %vm417_vm0, %v394_v19 }
  0x32   : > { %1511 = vmatprep.mubr.msk.f32.mxu1 %vm417_vm0, %v395_v20  ;;  %684 = vperm.xlu1 %1688, %v622_v22  }
  0x33   : > { %679 = vperm.xlu0 %1687, %v621_v25  }
  0x35   : > { %1512 = vmatmul.mubr.msk.f32.gmra.mxu1 %vm417_vm0, %v396_v23 }
  0x36   : > { %1514 = vmatprep.mubr.msk.f32.mxu1 %vm417_vm0, %v397_v24  ;;  %694 = vperm.xlu1 %1688, %v624_v26  }
  0x37   : > { %689 = vperm.xlu0 %1687, %v623_v29  }
  0x39   : > { %1515 = vmatmul.mubr.msk.f32.gmra.mxu1 %vm417_vm0, %v398_v27 }
  0x3a   : > { %1517 = vmatprep.mubr.msk.f32.mxu1 %vm417_vm0, %v399_v28  ;;  %704 = vperm.xlu1 %1688, %v626_v30  }
  0x3b   : > { %699 = vperm.xlu0 %1687, %v625_v33  }
  0x3d   : > { %1518 = vmatmul.mubr.msk.f32.gmra.mxu1 %vm417_vm0, %v400_v31 }
  0x3e   : > { %1520 = vmatprep.mubr.msk.f32.mxu1 %vm417_vm0, %v401_v32 }
  0x41   : > { %1521 = vmatmul.mubr.msk.f32.gmra.mxu1 %vm417_vm0, %v402_v34 }
  0x42   : > { %1523 = vmatprep.mubr.msk.f32.mxu1 %vm417_vm0, %v403_v35 }
  0x45   : > { %1524 = vmatmul.mubr.msk.f32.gmra.mxu1 %vm417_vm0, %v404_v36 }
  0x46   : > { %1526 = vmatprep.mubr.msk.f32.mxu1 %vm417_vm0, %v405_v37 }
  0x49   : > { %1527 = vmatmul.mubr.msk.f32.gmra.mxu1 %vm417_vm0, %v406_v38 }
  0x4a   : > { %1529 = vmatprep.mubr.msk.f32.mxu1 %vm417_vm0, %v407_v39 }
  0x4d   : > { %1530 = vmatmul.mubr.msk.f32.gmra.mxu1 %vm417_vm0, %v408_v40 }
  0x4e   : > { %1564 = vmatprep.mubr.f32.mxu1 %v409_v44 }
  0x99   : > { %v640_v42 = vpop.permute.xlu1 %639 }
  0x9a   : > { %v630_v43 = vpop.permute.xlu0 %629 }
  0x9d   : > { %v645_v45 = vpop.permute.xlu1 %644 }
  0x9e   : > { %v635_v46 = vpop.permute.xlu0 %634 }
  0xa1   : > { %v655_v47 = vpop.permute.xlu1 %654 }
  0xa2   : > { %v650_v48 = vpop.permute.xlu0 %649 }
  0xa5   : > { %v665_v51 = vpop.permute.xlu1 %664 }
  0xa6   : > { %v660_v53 = vpop.permute.xlu0 %659 }
  0xa9   : > { %v675_v56 = vpop.permute.xlu1 %674 }
  0xaa   : > { %v670_v58 = vpop.permute.xlu0 %669 }
  0xad   : > { %v685_v61 = vpop.permute.xlu1 %684 }
  0xae   : > { %v680_v63 = vpop.permute.xlu0 %679 }
  0xb1   : > { %v695_v2 = vpop.permute.xlu1 %694 }
  0xb2   : > { %v690_v9 = vpop.permute.xlu0 %689 }
  0xb5   : > { %v705_v29 = vpop.permute.xlu1 %704 }
  0xb6   : > { %v700_v37 = vpop.permute.xlu0 %699 }
  0xf1   : > { %v1510_v49 = vpop.f32.mrf.mxu1 }
  0xf2   : > { %v2144_v20 = vsub.f32 %v635_v46, %v1510_v49 }
  0xf3   : > { %v532_v50 = vpop.f32.mrf.mxu1 }
  0xf4   : > { %v2140_v17 = vsub.f32 %v630_v43, %v532_v50 }
  0xf5   : > { %v1513_v52 = vpop.f32.mrf.mxu1 }
  0xf6   : > { %v2146_v21 = vsub.f32 %v645_v45, %v1513_v52  ;;  %v723_v52 = vlaneseq }
  0xf7   : > { %v542_v54 = vpop.f32.mrf.mxu1 }
  0xf8   : > { %v709_v22 = vsub.f32 %v640_v42, %v542_v54 }
  0xf9   : > { %v1516_v55 = vpop.f32.mrf.mxu1 }
  0xfa   : > { %v2136_v10 = vsub.f32 %v655_v47, %v1516_v55  ;;  %v2170_v55 = vshrl.u32 %v723_v52, 7 }
  0xfb   : > { %v552_v57 = vpop.f32.mrf.mxu1 }
  0xfc   : > { %v2134_v7 = vsub.f32 %v650_v48, %v552_v57  ;;  %v741_v30 = vmin.f32 %v2144_v20, %v2136_v10 }
  0xfd   : > { %v1519_v59 = vpop.f32.mrf.mxu1 }
  0xfe   : > { %v2138_v13 = vsub.f32 %v665_v51, %v1519_v59  ;;  %v740_v25 = vmin.f32 %v2140_v17, %v2134_v7  ;;  %v2176_v59 = vadd.s32 48, %v2170_v55 }
  0xff   : > { %v562_v60 = vpop.f32.mrf.mxu1 }
 0x100   : > { %v713_v18 = vsub.f32 %v660_v53, %v562_v60  ;;  %v743_v31 = vmin.f32 %v2146_v21, %v2138_v13  ;;  %v2179_v60 = vadd.s32 80, %v2170_v55 }
 0x101   : > { %v1522_v62 = vpop.f32.mrf.mxu1 }
 0x102   : > { %v2148_v23 = vsub.f32 %v675_v56, %v1522_v62  ;;  %v742_v33 = vmin.f32 %v709_v22, %v713_v18 }
 0x103   : > { %v572_v0 = vpop.f32.mrf.mxu1 }
 0x104   : > { %v2142_v19 = vsub.f32 %v670_v58, %v572_v0  ;;  %v745_v38 = vmin.f32 %v741_v30, %v2148_v23  ;;  %v2173_v58 = vadd.s32 16, %v2170_v55  ;;  %v2188_v0 = vadd.s32 24, %v2170_v55 }
 0x105   : > { %v1525_v1 = vpop.f32.mrf.mxu1  ;;  %v2211_v30 = vadd.s32 96, %v2170_v55 }
 0x106   : > { %v2152_v26 = vsub.f32 %v685_v61, %v1525_v1  ;;  %v744_v34 = vmin.f32 %v740_v25, %v2142_v19  ;;  %v2182_v61 = vadd.s32 112, %v2170_v55  ;;  %v2191_v1 = vadd.s32 32, %v2170_v55 }
 0x107   : > { %v582_v6 = vpop.f32.mrf.mxu1 }
 0x108   : > { %v717_v27 = vsub.f32 %v680_v63, %v582_v6  ;;  %v747_v40 = vmin.f32 %v743_v31, %v2152_v26  ;;  %v2185_v63 = vadd.s32 8, %v2170_v55  ;;  %v2197_v6 = vadd.s32 56, %v2170_v55 }
 0x109   : > { %v1528_v14 = vpop.f32.mrf.mxu1  ;;  %v2214_v31 = vadd.s32 104, %v2170_v55 }
 0x10a   : > { %v2161_v35 = vsub.f32 %v695_v2, %v1528_v14  ;;  %v746_v42 = vmin.f32 %v742_v33, %v717_v27  ;;  %v2194_v2 = vadd.s32 40, %v2170_v55  ;;  %v2203_v14 = vadd.s32 72, %v2170_v55 }
 0x10b   : > { %v592_v24 = vpop.f32.mrf.mxu1 }
 0x10c   : > { %v2154_v28 = vsub.f32 %v690_v9, %v592_v24  ;;  %v749_v45 = vmin.f32 %v745_v38, %v2161_v35  ;;  %v2200_v9 = vadd.s32 64, %v2170_v55  ;;  %v2206_v24 = vadd.s32 88, %v2170_v55 }
 0x10d   : > { %v1531_v32 = vpop.f32.mrf.mxu1 }
 0x10e   : > { %v2163_v36 = vsub.f32 %v705_v29, %v1531_v32  ;;  %v748_v43 = vmin.f32 %v744_v34, %v2154_v28 }
 0x10f   : > { %v602_v39 = vpop.f32.mrf.mxu1 }
 0x110   : > { %v721_v44 = vsub.f32 %v700_v37, %v602_v39  ;;  %v751_v46 = vmin.f32 %v747_v40, %v2163_v36  ;;  %v752_v48 = vmin.f32 %v748_v43, %v749_v45 }
 0x112   : > { %v750_v47 = vmin.f32 %v746_v42, %v721_v44 }
 0x114   : > { %v753_v49 = vmin.f32 %v750_v47, %v751_v46 }
 0x116   : > { %v754_v50 = vmin.f32 %v752_v48, %v753_v49 }
 0x118   : > { %v755_v51 = vrot.slane %v754_v50, 4 }
 0x11a   : > { %v756_v53 = vmin.f32 %v754_v50, %v755_v51 }
 0x11c   : > { %v757_v54 = vrot.slane %v756_v53, 2 }
 0x11e   : > { %v758_v56 = vmin.f32 %v756_v53, %v757_v54  ;;  %v832_v53 = vld [vmem:[%s384_s20] sm:$0x1]  ;;  %s2490_s20 = sshll.u32 %s1843_s30, 4 }
 0x11f   : > { %s1144_s26 = scalar_lea.hbm %s2659_s6, %s2490_s20 }
 0x120   : > { %v759_v57 = vrot.slane %v758_v56, 1 }
 0x122   : > { %v760_v62 = vmin.f32 %v758_v56, %v759_v57  ;;  %v837_v57 = vsub.s32 0, %v2170_v55 }
 0x124   : > { %vm763_vm2 = vcmp.eq.f32.partialorder %v709_v22, %v760_v62  ;;  %vm767_vm3 = vcmp.eq.f32.partialorder %v713_v18, %v760_v62  ;;  %vm771_vm4 = vcmp.eq.f32.partialorder %v717_v27, %v760_v62  ;;  %vm775_vm5 = vcmp.eq.f32.partialorder %v721_v44, %v760_v62 }
 0x125   : > { %v779_v25 = vsel %vm763_vm2, %v2173_v58, 128  ;;  %v783_v29 = vsel %vm767_vm3, %v2176_v59, 128  ;;  %v787_v32 = vsel %vm771_vm4, %v2179_v60, 128  ;;  %v2218_v18 = vadd.s32 120, %v2170_v55 }
 0x126   : > { %vm797_vm6 = vcmp.lt.s32.totalorder %v779_v25, %v783_v29  ;;  %vm761_vm7 = vcmp.eq.f32.partialorder %v2140_v17, %v760_v62  ;;  %vm762_vm8 = vcmp.eq.f32.partialorder %v2144_v20, %v760_v62  ;;  %vm764_vm9 = vcmp.eq.f32.partialorder %v2146_v21, %v760_v62 }
 0x127   : > { %v798_v22 = vsel %vm797_vm6, %v779_v25, %v783_v29  ;;  %vm765_vm11 = vcmp.eq.f32.partialorder %v2134_v7, %v760_v62  ;;  %vm766_vm12 = vcmp.eq.f32.partialorder %v2136_v10, %v760_v62  ;;  %vm768_vm13 = vcmp.eq.f32.partialorder %v2138_v13, %v760_v62 }
 0x128   : > { %vm805_vm10 = vcmp.lt.s32.totalorder %v798_v22, %v787_v32  ;;  %v791_v27 = vsel %vm775_vm5, %v2182_v61, 128  ;;  %vm769_vm14 = vcmp.eq.f32.partialorder %v2142_v19, %v760_v62  ;;  %vm770_vm15 = vcmp.eq.f32.partialorder %v2148_v23, %v760_v62 }
 0x129   : > { %v806_v33 = vsel %vm805_vm10, %v798_v22, %v787_v32  ;;  %vm772_vm1 = vcmp.eq.f32.partialorder %v2152_v26, %v760_v62  ;;  %v777_v17 = vsel %vm761_vm7, %v2170_v55, 128  ;;  %v778_v20 = vsel %vm762_vm8, %v2185_v63, 128 }
 0x12a   : > { %vm813_vm0 = vcmp.lt.s32.totalorder %v806_v33, %v791_v27  ;;  %v780_v7 = vsel %vm764_vm9, %v2188_v0, 128  ;;  %v781_v10 = vsel %vm765_vm11, %v2191_v1, 128  ;;  %v782_v13 = vsel %vm766_vm12, %v2194_v2, 128 }
 0x12b   : > { %v784_v21 = vsel %vm768_vm13, %v2197_v6, 128  ;;  %v814_v34 = vsel %vm813_vm0, %v806_v33, %v791_v27  ;;  %vm773_vm2 = vcmp.eq.f32.partialorder %v2154_v28, %v760_v62  ;;  %vm774_vm3 = vcmp.eq.f32.partialorder %v2161_v35, %v760_v62 }
 0x12c   : > { %vm776_vm4 = vcmp.eq.f32.partialorder %v2163_v36, %v760_v62  ;;  %v785_v19 = vsel %vm769_vm14, %v2200_v9, 128  ;;  %v786_v23 = vsel %vm770_vm15, %v2203_v14, 128  ;;  %vm793_vm5 = vcmp.lt.s32.totalorder %v777_v17, %v781_v10 }
 0x12d   : > { %vm795_vm6 = vcmp.lt.s32.totalorder %v778_v20, %v782_v13  ;;  %v788_v26 = vsel %vm772_vm1, %v2206_v24, 128  ;;  %v794_v37 = vsel %vm793_vm5, %v777_v17, %v781_v10  ;;  %vm799_vm7 = vcmp.lt.s32.totalorder %v780_v7, %v784_v21 }
 0x12e   : > { %v796_v38 = vsel %vm795_vm6, %v778_v20, %v782_v13  ;;  %v789_v39 = vsel %vm773_vm2, %v2211_v30, 128  ;;  %v800_v40 = vsel %vm799_vm7, %v780_v7, %v784_v21  ;;  %vm801_vm8 = vcmp.lt.s32.totalorder %v794_v37, %v785_v19 }
 0x12f   : > { %vm803_vm9 = vcmp.lt.s32.totalorder %v796_v38, %v786_v23  ;;  %v790_v28 = vsel %vm774_vm3, %v2214_v31, 128  ;;  %v802_v35 = vsel %vm801_vm8, %v794_v37, %v785_v19  ;;  %vm807_vm10 = vcmp.lt.s32.totalorder %v800_v40, %v788_v26 }
 0x130   : > { %v804_v42 = vsel %vm803_vm9, %v796_v38, %v786_v23  ;;  %v792_v43 = vsel %vm776_vm4, %v2218_v18, 128  ;;  %v808_v44 = vsel %vm807_vm10, %v800_v40, %v788_v26  ;;  %vm809_vm11 = vcmp.lt.s32.totalorder %v802_v35, %v789_v39 }
 0x131   : > { %vm811_vm12 = vcmp.lt.s32.totalorder %v804_v42, %v790_v28  ;;  %v810_v45 = vsel %vm809_vm11, %v802_v35, %v789_v39  ;;  %vm815_vm13 = vcmp.lt.s32.totalorder %v808_v44, %v792_v43  ;;  %vm833_vm3 = vcmp.ge.s32.totalorder %v832_v53, 0 }
 0x132   : > { %v812_v46 = vsel %vm811_vm12, %v804_v42, %v790_v28  ;;  %v816_v47 = vsel %vm815_vm13, %v808_v44, %v792_v43  ;;  %v1856_v32 = vmov 1.0  }
 0x133   : > { %vm817_vm14 = vcmp.lt.s32.totalorder %v810_v45, %v812_v46  ;;  %vm819_vm15 = vcmp.lt.s32.totalorder %v814_v34, %v816_v47 }
 0x134   : > { %v818_v48 = vsel %vm817_vm14, %v810_v45, %v812_v46  ;;  %v820_v49 = vsel %vm819_vm15, %v814_v34, %v816_v47 }
 0x135   : > { %vm821_vm0 = vcmp.lt.s32.totalorder %v818_v48, %v820_v49 }
 0x136   : > { %v822_v50 = vsel %vm821_vm0, %v818_v48, %v820_v49 }
 0x137   : > { %v823_v51 = vrot.slane %v822_v50, 4 }
 0x139   : > { %vm824_vm1 = vcmp.lt.s32.totalorder %v822_v50, %v823_v51 }
 0x13a   : > { %v825_v36 = vsel %vm824_vm1, %v822_v50, %v823_v51 }
 0x13b   : > { %v826_v52 = vrot.slane %v825_v36, 2 }
 0x13d   : > { %vm827_vm2 = vcmp.lt.s32.totalorder %v825_v36, %v826_v52 }
 0x13e   : > { %v828_v54 = vsel %vm827_vm2, %v825_v36, %v826_v52 }
 0x13f   : > { %v829_v56 = vrot.slane %v828_v54, 1 }
 0x141   : > { %vm830_vm4 = vcmp.lt.s32.totalorder %v828_v54, %v829_v56 }
 0x142   : > { %v831_v62 = vsel %vm830_vm4, %v828_v54, %v829_v56 }
 0x143   : > { %v834_v25 = vsel %vm833_vm3, %v832_v53, %v831_v62 }
 0x144   : > { %v2255_v29 = vrot.slane %v834_v25, %v837_v57  ;;  %1000 = vst [vmem:[%s358_s23] sm:$0x1] %v834_v25 }
 0x146   : > { %vm854_vm5 = vcmp.eq.s32.totalorder %v2218_v18, %v2255_v29  ;;  %vm853_vm6 = vcmp.eq.s32.totalorder %v2182_v61, %v2255_v29  ;;  %vm852_vm7 = vcmp.eq.s32.totalorder %v2214_v31, %v2255_v29  ;;  %vm851_vm8 = vcmp.eq.s32.totalorder %v2211_v30, %v2255_v29  ;;  %v411_v61 = vld [vmem:[%s2670_s2 + $0x10] sm:$0xff] }
 0x147   : > { %1532 = vmatprep.subr.msk.mxu1 %vm854_vm5, %v1856_v32  ;;  %1577 = vmatpush3.xpose.msk.msra.mxu0 %vm854_vm5, %v1856_v32  ;;  %vm850_vm9 = vcmp.eq.s32.totalorder %v2206_v24, %v2255_v29  ;;  %vm849_vm10 = vcmp.eq.s32.totalorder %v2179_v60, %v2255_v29  ;;  %vm848_vm11 = vcmp.eq.s32.totalorder %v2203_v14, %v2255_v29  ;;  %v410_v60 = vld [vmem:[%s2670_s2 + $0x8] sm:$0xff]  ;;  %v413_v14 = vld [vmem:[%s2670_s2 + $0x20] sm:$0xff]  ;;  %v415_v24 = vld [vmem:[%s2670_s2 + $0x30] sm:$0xff] }
 0x148   : > { %1533 = vmatpush3.msk.msra.mxu1 %vm854_vm5, %v1856_v32  ;;  %1578 = vmatprep.subr.mxu0 %v1854_v41  ;;  %vm847_vm12 = vcmp.eq.s32.totalorder %v2200_v9, %v2255_v29  ;;  %vm846_vm13 = vcmp.eq.s32.totalorder %v2197_v6, %v2255_v29  ;;  %vm845_vm14 = vcmp.eq.s32.totalorder %v2176_v59, %v2255_v29  ;;  %v412_v9 = vld [vmem:[%s2670_s2 + $0x18] sm:$0xff]  ;;  %v414_v6 = vld [vmem:[%s2670_s2 + $0x28] sm:$0xff] }
 0x149   : > { %1534 = vmatprep.subr.msk.mxu1 %vm853_vm6, %v1856_v32  ;;  %vm844_vm15 = vcmp.eq.s32.totalorder %v2194_v2, %v2255_v29  ;;  %vm843_vm0 = vcmp.eq.s32.totalorder %v2191_v1, %v2255_v29  ;;  %vm842_vm1 = vcmp.eq.s32.totalorder %v2188_v0, %v2255_v29  ;;  %vm841_vm2 = vcmp.eq.s32.totalorder %v2173_v58, %v2255_v29  ;;  %v416_v59 = vld [vmem:[%s2670_s2 + $0x38] sm:$0xff] }
 0x14a   : > { %1535 = vmatpush3.msk.msra.mxu1 %vm853_vm6, %v1856_v32  ;;  %vm840_vm3 = vcmp.eq.s32.totalorder %v2185_v63, %v2255_v29  ;;  %vm839_vm4 = vcmp.eq.s32.totalorder %v2170_v55, %v2255_v29 }
 0x14b   : > { %1536 = vmatprep.subr.msk.mxu1 %vm852_vm7, %v1856_v32  ;;  %1579 = vmatpush3.xpose.msk.msra.mxu0 %vm853_vm6, %v1856_v32 }
 0x14c   : > { %1537 = vmatpush3.msk.msra.mxu1 %vm852_vm7, %v1856_v32  ;;  %1580 = vmatprep.subr.mxu0 %v1854_v41 }
 0x14d   : > { %1538 = vmatprep.subr.msk.mxu1 %vm851_vm8, %v1856_v32 }
 0x14e   : > { %1539 = vmatpush3.msk.msra.mxu1 %vm851_vm8, %v1856_v32 }
 0x14f   : > { %1540 = vmatprep.subr.msk.mxu1 %vm850_vm9, %v1856_v32  ;;  %1581 = vmatpush3.xpose.msk.msra.mxu0 %vm852_vm7, %v1856_v32 }
 0x150   : > { %1541 = vmatpush3.msk.msra.mxu1 %vm850_vm9, %v1856_v32  ;;  %1582 = vmatprep.subr.mxu0 %v1854_v41 }
 0x151   : > { %1542 = vmatprep.subr.msk.mxu1 %vm849_vm10, %v1856_v32 }
 0x152   : > { %1543 = vmatpush3.msk.msra.mxu1 %vm849_vm10, %v1856_v32 }
 0x153   : > { %1544 = vmatprep.subr.msk.mxu1 %vm848_vm11, %v1856_v32  ;;  %1583 = vmatpush3.xpose.msk.msra.mxu0 %vm851_vm8, %v1856_v32 }
 0x154   : > { %1545 = vmatpush3.msk.msra.mxu1 %vm848_vm11, %v1856_v32  ;;  %1584 = vmatprep.subr.mxu0 %v1854_v41 }
 0x155   : > { %1546 = vmatprep.subr.msk.mxu1 %vm847_vm12, %v1856_v32 }
 0x156   : > { %1547 = vmatpush3.msk.msra.mxu1 %vm847_vm12, %v1856_v32 }
 0x157   : > { %1548 = vmatprep.subr.msk.mxu1 %vm846_vm13, %v1856_v32  ;;  %1585 = vmatpush3.xpose.msk.msra.mxu0 %vm850_vm9, %v1856_v32 }
 0x158   : > { %1549 = vmatpush3.msk.msra.mxu1 %vm846_vm13, %v1856_v32  ;;  %1586 = vmatprep.subr.mxu0 %v1854_v41 }
 0x159   : > { %1550 = vmatprep.subr.msk.mxu1 %vm845_vm14, %v1856_v32 }
 0x15a   : > { %1551 = vmatpush3.msk.msra.mxu1 %vm845_vm14, %v1856_v32 }
 0x15b   : > { %1552 = vmatprep.subr.msk.mxu1 %vm844_vm15, %v1856_v32  ;;  %1587 = vmatpush3.xpose.msk.msra.mxu0 %vm849_vm10, %v1856_v32 }
 0x15c   : > { %1553 = vmatpush3.msk.msra.mxu1 %vm844_vm15, %v1856_v32  ;;  %1588 = vmatprep.subr.mxu0 %v1854_v41 }
 0x15d   : > { %1554 = vmatprep.subr.msk.mxu1 %vm843_vm0, %v1856_v32 }
 0x15e   : > { %1555 = vmatpush3.msk.msra.mxu1 %vm843_vm0, %v1856_v32 }
 0x15f   : > { %1556 = vmatprep.subr.msk.mxu1 %vm842_vm1, %v1856_v32  ;;  %1589 = vmatpush3.xpose.msk.msra.mxu0 %vm848_vm11, %v1856_v32 }
 0x160   : > { %1557 = vmatpush3.msk.msra.mxu1 %vm842_vm1, %v1856_v32  ;;  %1590 = vmatprep.subr.mxu0 %v1854_v41 }
 0x161   : > { %1558 = vmatprep.subr.msk.mxu1 %vm841_vm2, %v1856_v32 }
 0x162   : > { %1559 = vmatpush3.msk.msra.mxu1 %vm841_vm2, %v1856_v32 }
 0x163   : > { %1560 = vmatprep.subr.msk.mxu1 %vm840_vm3, %v1856_v32  ;;  %1591 = vmatpush3.xpose.msk.msra.mxu0 %vm847_vm12, %v1856_v32 }
 0x164   : > { %1561 = vmatpush3.msk.msra.mxu1 %vm840_vm3, %v1856_v32  ;;  %1592 = vmatprep.subr.mxu0 %v1854_v41 }
 0x165   : > { %1562 = vmatprep.subr.msk.mxu1 %vm839_vm4, %v1856_v32 }
 0x166   : > { %1563 = vmatpush3.msk.msra.mxu1 %vm839_vm4, %v1856_v32 }
 0x167   : > { %1565 = vmatmul.mubr.f32.vlgmr.msra.gmra.mxu1 %v410_v60  ;;  %1593 = vmatpush3.xpose.msk.msra.mxu0 %vm846_vm13, %v1856_v32 }
 0x168   : > { %1567 = vmatprep.mubr.f32.mxu1 %v411_v61  ;;  %1594 = vmatprep.subr.mxu0 %v1854_v41 }
 0x16b   : > { %1568 = vmatmul.mubr.f32.gmra.mxu1 %v412_v9  ;;  %1595 = vmatpush3.xpose.msk.msra.mxu0 %vm845_vm14, %v1856_v32 }
 0x16c   : > { %1570 = vmatprep.mubr.f32.mxu1 %v413_v14  ;;  %1596 = vmatprep.subr.mxu0 %v1854_v41 }
 0x16f   : > { %1571 = vmatmul.mubr.f32.gmra.mxu1 %v414_v6  ;;  %1597 = vmatpush3.xpose.msk.msra.mxu0 %vm844_vm15, %v1856_v32 }
 0x170   : > { %1573 = vmatprep.mubr.f32.mxu1 %v415_v24  ;;  %1598 = vmatprep.subr.mxu0 %v1854_v41 }
 0x173   : > { %1574 = vmatmul.mubr.f32.gmra.mxu1 %v416_v59  ;;  %1599 = vmatpush3.xpose.msk.msra.mxu0 %vm843_vm0, %v1856_v32 }
 0x174   : > { %1600 = vmatprep.subr.mxu0 %v1854_v41 }
 0x177   : > { %1601 = vmatpush3.xpose.msk.msra.mxu0 %vm842_vm1, %v1856_v32 }
 0x178   : > { %1602 = vmatprep.subr.mxu0 %v1854_v41 }
 0x17b   : > { %1603 = vmatpush3.xpose.msk.msra.mxu0 %vm841_vm2, %v1856_v32 }
 0x17c   : > { %1604 = vmatprep.subr.mxu0 %v1854_v41 }
 0x17f   : > { %1605 = vmatpush3.xpose.msk.msra.mxu0 %vm840_vm3, %v1856_v32 }
 0x180   : > { %1606 = vmatprep.subr.mxu0 %v1854_v41 }
 0x183   : > { %1607 = vmatpush3.xpose.msk.msra.mxu0 %vm839_vm4, %v1856_v32 }
 0x186   : > { %1609 = vmatmul.mubr.f32.vlgmr.msra.gmra.mxu0 %v1856_v32 }
 0x187   : > { %1702 = shalt.err (!%p1699_p5)
}
 0x188   : > { %s1703_s21 = scalar_lea.hbm %s1144_s26, 16  ;;  %s1707_s16 = scalar_lea.hbm %s2659_s6, 32 }
 0x189   : > { %p1704_p6 = scmp.ne.s32.totalorder %s1144_s26, %s1703_s21  ;;  %p1708_p10 = scmp.lt.s32.totalorder %s1144_s26, %s2659_s6 }
 0x18a   : > { %p1709_p11 = scmp.lt.s32.totalorder %s1707_s16, %s1703_s21 }
 0x18b   : > { %p1705_p7 = pnand %p1704_p6, %p1950_p4 }
 0x18c   : > { %p1710_p12 = por %p1709_p11, %p1708_p10 }
 0x18d   : > { %p1706_p9 = pneg %p1705_p7 }
 0x18f   : > { %p1711_p13 = pnand %p1710_p12, %p1706_p9 }
 0x191   : > { %1714 = shalt.err (!%p1711_p13)
}
 0x192   : > { %s2671_s0 = scalar_lea.sflag [#allocation5], %s2487_s25  ;;  %s1350_s12 = sshll.u32 %s2252_s22, 6 }
 0x193   : > { %1612 = dma.vmem_to_hbm [thread:$0]  (%p1950_p4), %s1147_s14, 16, %s1144_s26, %s2671_s0  }
 0x194   : > { %s2514_s19 = scalar_lea.vmem [#allocation2], %s1350_s12  ;;  %s1426_s1 = sshll.u32 %s1843_s30, 10 }
 0x195   : > { %s1129_s2 = sshll.u32 %s2514_s19, 4  ;;  %s2533_s16 = scalar_lea.hbm %s2658_s5, %s1426_s1  ;;  %s2535_s2 = int_to_ptr.vmem [resolvable:$true] %s1129_s2 }
 0x196   : > { %s1103_s30 = scalar_lea.sflag [#allocation3], %s2252_s22  ;;  %s1715_s11 = scalar_lea.vmem %s2535_s2, 1024 }
 0x197   : > { %p1716_p0 = scmp.ne.s32.totalorder %s2535_s2, %s1715_s11  ;;  %s1858_s21 = smov [#allocation2]  }
 0x198   : > { %s1719_s23 = sshll.u32 %s1858_s21, 4  ;;  %s1720_s23 = int_to_ptr.vmem [resolvable:$false] %s1719_s23 }
 0x199   : > { %p1717_p1 = pnand %p1716_p0, %p1950_p4  ;;  %s1721_s24 = scalar_lea.vmem %s1720_s23, 2048 }
 0x19a   : > { %p1722_p3 = scmp.lt.s32.totalorder %s2535_s2, %s1720_s23  ;;  %p1723_p5 = scmp.lt.s32.totalorder %s1721_s24, %s1715_s11 }
 0x19b   : > { %p1718_p2 = pneg %p1717_p1 }
 0x19c   : > { %p1724_p6 = por %p1723_p5, %p1722_p3 }
 0x19e   : > { %p1725_p7 = pnand %p1724_p6, %p1718_p2 }
 0x227   : > { %v1566_v41 = vpop.f32.mrf.mxu1 }
 0x228   : > { %993 = vst [vmem:[%s2514_s19 + $0x8] sm:$0xff] %v1566_v41  ;;  %v1073_v58 = vsub.f32 %v1566_v41, %v2031_v15 }
 0x229   : > { %v953_v55 = vpop.f32.mrf.mxu1 }
 0x22a   : > { %992 = vst [vmem:[%s2514_s19] sm:$0xff] %v953_v55  ;;  %v1072_v63 = vsub.f32 %v953_v55, %v2036_v16  ;;  %v1081_v30 = vmul.f32 %v1073_v58, %v1073_v58 }
 0x22b   : > { %v1569_v0 = vpop.f32.mrf.mxu1 }
 0x22c   : > { %v1080_v1 = vmul.f32 %v1072_v63, %v1072_v63  ;;  %995 = vst [vmem:[%s2514_s19 + $0x18] sm:$0xff] %v1569_v0  ;;  %v1075_v31 = vsub.f32 %v1569_v0, %v2015_v11 }
 0x22d   : > { %v963_v2 = vpop.f32.mrf.mxu1 }
 0x22e   : > { %994 = vst [vmem:[%s2514_s19 + $0x10] sm:$0xff] %v963_v2  ;;  %v1074_v18 = vsub.f32 %v963_v2, %v2020_v12  ;;  %v1088_v27 = vadd.f32 %v1081_v30, %v1080_v1  ;;  %v1083_v16 = vmul.f32 %v1075_v31, %v1075_v31 }
 0x22f   : > { %v1572_v22 = vpop.f32.mrf.mxu1 }
 0x230   : > { %v1082_v33 = vmul.f32 %v1074_v18, %v1074_v18  ;;  %997 = vst [vmem:[%s2514_s19 + $0x28] sm:$0xff] %v1572_v22  ;;  %v1077_v20 = vsub.f32 %v1572_v22, %v1993_v5 }
 0x231   : > { %v973_v15 = vpop.f32.mrf.mxu1 }
 0x232   : > { %v1089_v17 = vadd.f32 %v1088_v27, %v1082_v33  ;;  %996 = vst [vmem:[%s2514_s19 + $0x20] sm:$0xff] %v973_v15  ;;  %v1076_v11 = vsub.f32 %v973_v15, %v2004_v8  ;;  %v1085_v5 = vmul.f32 %v1077_v20, %v1077_v20 }
 0x233   : > { %v1575_v7 = vpop.f32.mrf.mxu1 }
 0x234   : > { %v1084_v12 = vmul.f32 %v1076_v11, %v1076_v11  ;;  %v1090_v10 = vadd.f32 %v1089_v17, %v1083_v16  ;;  %999 = vst [vmem:[%s2514_s19 + $0x38] sm:$0xff] %v1575_v7  ;;  %v1079_v8 = vsub.f32 %v1575_v7, %v1985_v3 }
 0x235   : > { %v983_v13 = vpop.f32.mrf.mxu1 }
 0x236   : > { %v1091_v21 = vadd.f32 %v1090_v10, %v1084_v12  ;;  %998 = vst [vmem:[%s2514_s19 + $0x30] sm:$0xff] %v983_v13  ;;  %v1078_v34 = vsub.f32 %v983_v13, %v1988_v4 }
 0x237   : > { %1728 = shalt.err (!%p1725_p7)
}
 0x238   : > { %s1729_s0 = scalar_lea.hbm %s2533_s16, 1024  ;;  %s1733_s1 = scalar_lea.hbm %s2658_s5, 2048 }
 0x239   : > { %p1730_p9 = scmp.ne.s32.totalorder %s2533_s16, %s1729_s0  ;;  %p1734_p12 = scmp.lt.s32.totalorder %s2533_s16, %s2658_s5 }
 0x23a   : > { %p1735_p13 = scmp.lt.s32.totalorder %s1733_s1, %s1729_s0 }
 0x23b   : > { %p1731_p10 = pnand %p1730_p9, %p1950_p4 }
 0x23c   : > { %p1736_p0 = por %p1735_p13, %p1734_p12 }
 0x23d   : > { %p1732_p11 = pneg %p1731_p10 }
 0x23f   : > { %p1737_p1 = pnand %p1736_p0, %p1732_p11 }
 0x241   : > { %1740 = shalt.err (!%p1737_p1)
}
 0x242   : > { %s1859_s11 = smov 128   ;;  %s1860_s21 = smov 8   ;;  %v1086_v3 = vmul.f32 %v1078_v34, %v1078_v34  ;;  %v1092_v4 = vadd.f32 %v1091_v21, %v1085_v5  ;;  %v1087_v19 = vmul.f32 %v1079_v8, %v1079_v8 }
 0x243   : > { %1611 = dma.vmem_to_hbm [thread:$0]  (%p1950_p4), %s2535_s2, 1024, %s2533_s16, %s1103_s30, %s1859_s11, %s1859_s11, %s1860_s21  }
 0x244   : > { %v1093_v23 = vadd.f32 %v1092_v4, %v1086_v3  ;;  %s364_s23 = scalar_lea.vmem [#allocation6], %s2252_s22  ;;  %s370_s0 = scalar_lea.vmem [#allocation7], %s2252_s22 }
 0x245   : > { %s1160_s24 = sshll.u32 %s364_s23, 4  ;;  %s1174_s12 = sshll.u32 %s370_s0, 4  ;;  %s2568_s24 = int_to_ptr.vmem [resolvable:$true] %s1160_s24  ;;  %s2582_s12 = int_to_ptr.vmem [resolvable:$true] %s1174_s12 }
 0x246   : > { %v1094_v26 = vadd.f32 %v1093_v23, %v1087_v19  ;;  %s2574_s16 = scalar_lea.hbm %s2660_s7, %s2490_s20  ;;  %v1067_v28 = vpop.f32.mrf.mxu0  ;;  %s2580_s26 = scalar_lea.hbm %s2661_s8, %s2490_s20 }
 0x247   : > { %1071 = vst [vmem:[%s364_s23] sm:$0x1] %v1067_v28  ;;  %s1741_s14 = scalar_lea.vmem %s2568_s24, 16  ;;  %s1861_s11 = smov [#allocation6]  }
 0x248   : > { %v1095_v37 = vrot.slane %v1094_v26, 4  ;;  %v1610_v42 = vpop.f32.mrf.mxu0  ;;  %p1742_p2 = scmp.ne.s32.totalorder %s2568_s24, %s1741_s14  ;;  %s1745_s21 = sshll.u32 %s1861_s11, 4  ;;  %s1746_s21 = int_to_ptr.vmem [resolvable:$false] %s1745_s21 }
 0x249   : > { %s1747_s19 = scalar_lea.vmem %s1746_s21, 32  ;;  %p1748_p6 = scmp.lt.s32.totalorder %s2568_s24, %s1746_s21 }
 0x24a   : > { %v1096_v38 = vadd.f32 %v1095_v37, %v1094_v26  ;;  %p1743_p3 = pnand %p1742_p2, %p1950_p4  ;;  %p1749_p7 = scmp.lt.s32.totalorder %s1747_s19, %s1741_s14 }
 0x24c   : > { %v1097_v39 = vrot.slane %v1096_v38, 2  ;;  %p1744_p5 = pneg %p1743_p3  ;;  %p1750_p9 = por %p1749_p7, %p1748_p6 }
 0x24e   : > { %v1098_v40 = vadd.f32 %v1097_v39, %v1096_v38  ;;  %p1751_p10 = pnand %p1750_p9, %p1744_p5 }
 0x250   : > { %v1099_v35 = vrot.slane %v1098_v40, 1 }
 0x251   : > { %1754 = shalt.err (!%p1751_p10)
}
 0x252   : > { %s1755_s20 = scalar_lea.hbm %s2574_s16, 16  ;;  %s1759_s30 = scalar_lea.hbm %s2660_s7, 32 }
 0x253   : > { %p1756_p11 = scmp.ne.s32.totalorder %s2574_s16, %s1755_s20  ;;  %p1760_p0 = scmp.lt.s32.totalorder %s2574_s16, %s2660_s7 }
 0x254   : > { %p1761_p1 = scmp.lt.s32.totalorder %s1759_s30, %s1755_s20 }
 0x255   : > { %p1757_p12 = pnand %p1756_p11, %p1950_p4 }
 0x256   : > { %p1762_p2 = por %p1761_p1, %p1760_p0 }
 0x257   : > { %p1758_p13 = pneg %p1757_p12 }
 0x259   : > { %p1763_p3 = pnand %p1762_p2, %p1758_p13 }
 0x25b   : > { %1766 = shalt.err (!%p1763_p3)
}
 0x25c   : > { %s2672_s14 = scalar_lea.sflag [#allocation5], %s2487_s25  ;;  %v1100_v43 = vadd.f32 %v1099_v35, %v1098_v40  ;;  %s1116_s21 = scalar_lea.sflag [#allocation8], %s2252_s22 }
 0x25d   : > { %1613 = dma.vmem_to_hbm [thread:$0]  (%p1950_p4), %s2568_s24, 16, %s2574_s16, %s2672_s14  }
 0x25e   : > { %1101 = vst [vmem:[%s370_s0] sm:$0x1] %v1100_v43  ;;  %s1767_s19 = scalar_lea.vmem %s2582_s12, 16  ;;  %s1862_s20 = smov [#allocation7]  }
 0x25f   : > { %p1768_p5 = scmp.ne.s32.totalorder %s2582_s12, %s1767_s19  ;;  %s1771_s25 = sshll.u32 %s1862_s20, 4  ;;  %s1772_s25 = int_to_ptr.vmem [resolvable:$false] %s1771_s25 }
 0x260   : > { %s1773_s23 = scalar_lea.vmem %s1772_s25, 32  ;;  %p1774_p9 = scmp.lt.s32.totalorder %s2582_s12, %s1772_s25 }
 0x261   : > { %p1769_p6 = pnand %p1768_p5, %p1950_p4  ;;  %p1775_p10 = scmp.lt.s32.totalorder %s1773_s23, %s1767_s19 }
 0x263   : > { %p1770_p7 = pneg %p1769_p6  ;;  %p1776_p11 = por %p1775_p10, %p1774_p9 }
 0x265   : > { %p1777_p12 = pnand %p1776_p11, %p1770_p7 }
 0x267   : > { %1780 = shalt.err (!%p1777_p12)
}
 0x268   : > { %s1781_s24 = scalar_lea.hbm %s2580_s26, 16  ;;  %s1785_s16 = scalar_lea.hbm %s2661_s8, 32 }
 0x269   : > { %p1782_p13 = scmp.ne.s32.totalorder %s2580_s26, %s1781_s24  ;;  %p1786_p2 = scmp.lt.s32.totalorder %s2580_s26, %s2661_s8 }
 0x26a   : > { %p1787_p3 = scmp.lt.s32.totalorder %s1785_s16, %s1781_s24 }
 0x26b   : > { %p1783_p0 = pnand %p1782_p13, %p1950_p4 }
 0x26c   : > { %p1788_p5 = por %p1787_p3, %p1786_p2 }
 0x26d   : > { %p1784_p1 = pneg %p1783_p0 }
 0x26f   : > { %p1789_p6 = pnand %p1788_p5, %p1784_p1 }
 0x271   : > { %1792 = shalt.err (!%p1789_p6)
}
 0x272   : > { %1614 = dma.vmem_to_hbm [thread:$0]  (%p1950_p4), %s2582_s12, 16, %s2580_s26, %s1116_s21  }
 0x273 PF: > { %p1632_p7 = scmp.ge.s32.totalorder %s1851_s10, 2  ;;  %s1186_s1 = sand.u32 1, %s1831_s27  }
 0x274   : > { %s1187_s11 = scalar_lea.sflag [#allocation3], %s1186_s1 }
 0x275   : > { %p1620_p9 = pnand %p1632_p7, %p1959_p8 }
 0x277   : > { %p1621_p10 = pneg %p1620_p9 }
 0x279   : > { %1818 = dma.done.wait (%p1621_p10), %s1187_s11, 1024  }
 0x27a   : > { %1820 = vsyncadd (%p1621_p10), %s1187_s11, 4294966272  ;;  %s2673_s14 = sadd.s32 4294967294, %s1851_s10  }
 0x27b   : > { %s1195_s19 = sand.u32 1, %s2673_s14  }
 0x27c   : > { %s1196_s20 = scalar_lea.sflag [#allocation5], %s1195_s19 }
 0x27d   : > { %1822 = dma.done.wait (%p1621_p10), %s1196_s20, 32  }
 0x27e   : > { %1824 = vsyncadd (%p1621_p10), %s1196_s20, 4294967264  ;;  %s1212_s15 = scalar_lea.sflag [#allocation8], %s1186_s1 }
 0x27f   : > { %1826 = dma.done.wait (%p1621_p10), %s1212_s15, 16  }
 0x280   : > { %1828 = vsyncadd (%p1621_p10), %s1212_s15, 4294967280  ;;  %s28_s10 = sadd.s32 1, %s1851_s10   ;;  %s2674_s27 = smov %s1835_s28 }
 0x281   : > { %p25_p4 = scmp.ge.s32.totalorder %s28_s10, 4   ;;  %s2675_s28 = smov %s1839_s29 }
 0x282   : > { %s2676_s29 = smov %s1965_s18  ;;  %s2677_s30 = smov %s1847_s9 }
 0x283   : > { %s2678_s9 = smov %s2680_s13  ;;  %27 = sbr.rel (!%p25_p4) target bundleno = 12 (0xc), region = 127 }
 0x288   :  { %1216 = vsyncpa [#allocation3], 1 }
 0x289   :  { %1218 = vsyncpa [#allocation3 + $0x1], 1 }
 0x28a   :  { %1219 = vsyncpa [#allocation5], 1 }
 0x28b   :  { %1221 = vsyncpa [#allocation5 + $0x1], 1 }
 0x28c   :  { %1222 = vsyncpa [#allocation8], 1 }
 0x28d   :  { %1224 = vsyncpa [#allocation8 + $0x1], 1 }

</bundles_post_ra>
